<compile_context>
chip_gen: v7x
topology: tpu7x:2x2x1
jax: 0.10.0
libtpu: 0.0.40
codegen_flags: <defaults>
</compile_context>

<pallas_src>
import functools

import jax
import jax.numpy as jnp
from jax.experimental import pallas as pl
from jax.experimental.pallas import tpu as pltpu

LOG_STD_MIN = -20.0
LOG_STD_MAX = 2.0

_SUB = 16  # batch / state sublane quantum (covers f32 (8) and bf16 (16) packing)


def _round_up(x, m):
    return (x + m - 1) // m * m


# ---------------------------------------------------------------------------
# Kernel
# ---------------------------------------------------------------------------
def _make_actor_kernel(a_pad):
    """Kernel closure over the (static) padded per-head lane width."""

    def actor_kernel(x_ref, w1_ref, b12_ref, w2_ref, wh_ref, bh_ref,
                     mean_ref, log_std_ref):
        x = x_ref[...]

        # shared layer 1: h1 = relu(x @ W1 + b1)   (f32 accumulate, f32 VPU)
        h1 = jnp.dot(x, w1_ref[...], preferred_element_type=jnp.float32)
        h1 = jnp.maximum(h1 + b12_ref[0:1, :], 0.0)

        # shared layer 2: h2 = relu(h1 @ W2 + b2)
        h2 = jnp.dot(h1.astype(w2_ref.dtype), w2_ref[...],
                     preferred_element_type=jnp.float32)
        h2 = jnp.maximum(h2 + b12_ref[1:2, :], 0.0)

        # fused heads: [mean | log_std] = h2 @ [Wm | Ws]; each head owns its
        # own 128-lane group, so the split below is a free vreg-boundary slice.
        heads = jnp.dot(h2.astype(wh_ref.dtype), wh_ref[...],
                        preferred_element_type=jnp.float32)
        mean = heads[:, :a_pad] + bh_ref[0:1, :]
        log_std = jnp.clip(heads[:, a_pad:] + bh_ref[1:2, :],
                           LOG_STD_MIN, LOG_STD_MAX)

        mean_ref[...] = mean.astype(mean_ref.dtype)
        log_std_ref[...] = log_std.astype(log_std_ref.dtype)

    return actor_kernel


# ---------------------------------------------------------------------------
# Parameter preparation (head fusion + padding + dtype cast) -- done ONCE.
# ---------------------------------------------------------------------------
def prepare_params(params, compute_dtype=jnp.bfloat16, out_dtype=None):
    """Fuse heads/biases, pad to TPU-friendly shapes, cast matmul operands."""
    w1, b1 = params["w1"], params["b1"]
    w2, b2 = params["w2"], params["b2"]
    wm, bm = params["wm"], params["bm"]
    ws, bs = params["ws"], params["bs"]

    state_dim, hidden_dim = w1.shape
    action_dim = wm.shape[1]

    s_pad = _round_up(state_dim, _SUB)      # sublane quantum only (NOT 128)
    h_pad = _round_up(hidden_dim, 128)      # lane quantum (128); v6e/v7x MXU is
                                            # 256-wide -> prefer hidden_dim that
                                            # is a real multiple of 256 if tunable
    a_pad = _round_up(action_dim, 128)

    def pad2(a, rows, cols):
        return jnp.pad(a, ((0, rows - a.shape[0]), (0, cols - a.shape[1])))

    # heads fused along lanes, each head in its own 128-lane group
    wh = jnp.concatenate([pad2(wm, h_pad, a_pad), pad2(ws, h_pad, a_pad)], axis=1)
    bh = jnp.concatenate([pad2(bm, 1, a_pad), pad2(bs, 1, a_pad)], axis=0)   # (2, a_pad)
    b12 = jnp.concatenate([pad2(b1, 1, h_pad), pad2(b2, 1, h_pad)], axis=0)  # (2, h_pad)

    if out_dtype is None:
        out_dtype = compute_dtype

    prepped = dict(
        w1=pad2(w1, s_pad, h_pad).astype(compute_dtype),
        b12=b12.astype(jnp.float32),           # biases stay f32 (added to f32 acc)
        w2=pad2(w2, h_pad, h_pad).astype(compute_dtype),
        wh=wh.astype(compute_dtype),
        bh=bh.astype(jnp.float32),
    )
    meta = dict(state_dim=state_dim, hidden_dim=hidden_dim, action_dim=action_dim,
                s_pad=s_pad, h_pad=h_pad, a_pad=a_pad,
                compute_dtype=jnp.dtype(compute_dtype).name,
                out_dtype=jnp.dtype(out_dtype).name)
    return prepped, meta


# ---------------------------------------------------------------------------
# Forward wrapper
# ---------------------------------------------------------------------------
@functools.partial(jax.jit, static_argnames=("action_dim", "s_pad", "h_pad",
                                             "a_pad", "tile_batch",
                                             "compute_dtype", "out_dtype"))
def _actor_forward_impl(state, w1, b12, w2, wh, bh, *,
                        action_dim, s_pad, h_pad, a_pad, tile_batch,
                        compute_dtype, out_dtype):
    B, S = state.shape

    # Batch tile: multiple of 16 sublanes. Guarantee >= 2 grid steps when the
    # batch is big enough to split (uses both TCs on v7x; harmless elsewhere).
    rb = _round_up(B, _SUB)
    TB = min(tile_batch, rb)
    if TB == rb and B > _SUB:
        TB = _round_up((rb + 1) // 2, _SUB)
    B_pad = _round_up(B, TB)

    x = jnp.pad(state, ((0, B_pad - B), (0, s_pad - S))).astype(compute_dtype)

    const = lambda i: (0, 0)       # weights/biases: resident block across grid
    batch = lambda i: (i, 0)       # x / outputs: tiled along batch

    mean_p, log_std_p = pl.pallas_call(
        _make_actor_kernel(a_pad),
        out_shape=(jax.ShapeDtypeStruct((B_pad, a_pad), jnp.dtype(out_dtype)),
                   jax.ShapeDtypeStruct((B_pad, a_pad), jnp.dtype(out_dtype))),
        grid=(B_pad // TB,),
        in_specs=[
            pl.BlockSpec((TB, s_pad), batch),        # x (streamed per batch tile)
            pl.BlockSpec((s_pad, h_pad), const),     # W1
            pl.BlockSpec((2, h_pad), const),         # [b1; b2]
            pl.BlockSpec((h_pad, h_pad), const),     # W2
            pl.BlockSpec((h_pad, 2 * a_pad), const), # [Wm | Ws]
            pl.BlockSpec((2, a_pad), const),         # [bm; bs]
        ],
        out_specs=(pl.BlockSpec((TB, a_pad), batch),   # mean
                   pl.BlockSpec((TB, a_pad), batch)),  # log_std (clamped)
        compiler_params=pltpu.CompilerParams(
            dimension_semantics=("parallel",),       # shards batch across TCs (v7x)
        ),
    )(x, w1, b12, w2, wh, bh)

    mean = mean_p[:B, :action_dim]
    log_std = log_std_p[:B, :action_dim]
    return mean, log_std


def actor_forward(state, prepped, meta, tile_batch=1024):
    # v5e note: if the single vector-store slot saturates at large tiles,
    # use tile_batch=256-512 there; keep 1024+ on v6e/v7x.
    return _actor_forward_impl(
        state,
        prepped["w1"], prepped["b12"], prepped["w2"], prepped["wh"], prepped["bh"],
        action_dim=meta["action_dim"], s_pad=meta["s_pad"],
        h_pad=meta["h_pad"], a_pad=meta["a_pad"],
        tile_batch=tile_batch,
        compute_dtype=meta["compute_dtype"],
        out_dtype=meta["out_dtype"],
    )


# ---------------------------------------------------------------------------
# Init + pure-JAX reference
# ---------------------------------------------------------------------------
def init_params(key, state_dim, action_dim, hidden_dim):
    """torch.nn.Linear-style init; weights (in, out), biases (1, out)."""

    def linear(k, fan_in, fan_out):
        kw, kb = jax.random.split(k)
        bound = 1.0 / jnp.sqrt(fan_in)
        w = jax.random.uniform(kw, (fan_in, fan_out), jnp.float32, -bound, bound)
        b = jax.random.uniform(kb, (1, fan_out), jnp.float32, -bound, bound)
        return w, b

    k1, k2, k3, k4 = jax.random.split(key, 4)
    w1, b1 = linear(k1, state_dim, hidden_dim)
    w2, b2 = linear(k2, hidden_dim, hidden_dim)
    wm, bm = linear(k3, hidden_dim, action_dim)
    ws, bs = linear(k4, hidden_dim, action_dim)
    return dict(w1=w1, b1=b1, w2=w2, b2=b2, wm=wm, bm=bm, ws=ws, bs=bs)


def reference_forward(state, p):
    h1 = jnp.maximum(state @ p["w1"] + p["b1"], 0.0)
    h2 = jnp.maximum(h1 @ p["w2"] + p["b2"], 0.0)
    mean = h2 @ p["wm"] + p["bm"]
    log_std = jnp.clip(h2 @ p["ws"] + p["bs"], LOG_STD_MIN, LOG_STD_MAX)
    return mean, log_std


# ---------------------------------------------------------------------------
if __name__ == "__main__":
    batch, state_dim, action_dim, hidden_dim = 2, 8, 4, 32

    key = jax.random.PRNGKey(0)
    k_params, k_state, k_big = jax.random.split(key, 3)

    params = init_params(k_params, state_dim, action_dim, hidden_dim)
    state = jax.random.normal(k_state, (batch, state_dim), jnp.float32)
    mean_ref, log_std_ref = reference_forward(state, params)

    # --- f32 compute path: bit-level check against the pure-JAX reference ---
    prepped_f32, meta_f32 = prepare_params(params, compute_dtype=jnp.float32)
    mean_f, log_std_f = actor_forward(state, prepped_f32, meta_f32)
    jax.block_until_ready((mean_f, log_std_f))
    assert mean_f.shape == (batch, action_dim)
    assert log_std_f.shape == (batch, action_dim)
    assert jnp.allclose(mean_f, mean_ref, atol=1e-5, rtol=1e-5)
    assert jnp.allclose(log_std_f, log_std_ref, atol=1e-5, rtol=1e-5)

    # --- default bf16 compute path (f32 accumulation) ---
    prepped_bf16, meta_bf16 = prepare_params(params)   # bf16 default
    mean_b16, log_std_b16 = actor_forward(state, prepped_bf16, meta_bf16)
    jax.block_until_ready((mean_b16, log_std_b16))
    assert jnp.allclose(mean_b16.astype(jnp.float32), mean_ref, atol=1e-1, rtol=1e-1)
    assert jnp.allclose(log_std_b16.astype(jnp.float32), log_std_ref, atol=1e-1, rtol=1e-1)

    # --- larger batch exercising the batch-tiled grid (grid > 1) ---
    big_b = 130
    state_big = jax.random.normal(k_big, (big_b, state_dim), jnp.float32)
    mean_bref, log_std_bref = reference_forward(state_big, params)

    mean_bg, log_std_bg = actor_forward(state_big, prepped_f32, meta_f32, tile_batch=64)
    jax.block_until_ready((mean_bg, log_std_bg))
    assert jnp.allclose(mean_bg, mean_bref, atol=1e-5, rtol=1e-5)
    assert jnp.allclose(log_std_bg, log_std_bref, atol=1e-5, rtol=1e-5)

    mean_bg16, log_std_bg16 = actor_forward(state_big, prepped_bf16, meta_bf16)
    jax.block_until_ready((mean_bg16, log_std_bg16))
    assert jnp.allclose(mean_bg16.astype(jnp.float32), mean_bref, atol=1e-1, rtol=1e-1)
    assert jnp.allclose(log_std_bg16.astype(jnp.float32), log_std_bref, atol=1e-1, rtol=1e-1)

    # TODO(synk): `sample()` (Normal.rsample + tanh squash + log-prob) is a
    # random draw outside the deterministic forward path; left in plain JAX.

    print("KERNEL_OK")
</pallas_src>

<mosaic_0001>
module attributes {stable_mosaic.version = 11 : i64} {
  func.func @actor_kernel(%arg0: i32, %arg1: memref<16x16xf32, #tpu.memory_space<vmem>>, %arg2: memref<16x128xf32, #tpu.memory_space<vmem>>, %arg3: memref<2x128xf32, #tpu.memory_space<vmem>>, %arg4: memref<128x128xf32, #tpu.memory_space<vmem>>, %arg5: memref<128x256xf32, #tpu.memory_space<vmem>>, %arg6: memref<2x128xf32, #tpu.memory_space<vmem>>, %arg7: memref<16x128xf32, #tpu.memory_space<vmem>>, %arg8: memref<16x128xf32, #tpu.memory_space<vmem>>) attributes {dimension_semantics = [#tpu.dimension_semantics<parallel>], iteration_bounds = array<i64: 1>, scalar_prefetch = 0 : i64, scratch_operands = 0 : i64, tpu.core_type = #tpu.core_type<tc>, window_params = [{transform_indices = @transform_0, window_bounds = array<i64: 16, 16>}, {pipeline_mode = #tpu.pipeline_mode<synchronous>, transform_indices = @transform_1, window_bounds = array<i64: 16, 128>}, {pipeline_mode = #tpu.pipeline_mode<synchronous>, transform_indices = @transform_2, window_bounds = array<i64: 2, 128>}, {pipeline_mode = #tpu.pipeline_mode<synchronous>, transform_indices = @transform_3, window_bounds = array<i64: 128, 128>}, {pipeline_mode = #tpu.pipeline_mode<synchronous>, transform_indices = @transform_4, window_bounds = array<i64: 128, 256>}, {pipeline_mode = #tpu.pipeline_mode<synchronous>, transform_indices = @transform_5, window_bounds = array<i64: 2, 128>}, {transform_indices = @transform_6, window_bounds = array<i64: 16, 128>}, {transform_indices = @transform_7, window_bounds = array<i64: 16, 128>}]} {
    %c0 = arith.constant 0 : index
    %c0_0 = arith.constant 0 : index
    %0 = vector.load %arg1[%c0, %c0_0] : memref<16x16xf32, #tpu.memory_space<vmem>>, vector<16x16xf32>
    %c0_1 = arith.constant 0 : index
    %c0_2 = arith.constant 0 : index
    %1 = vector.load %arg2[%c0_1, %c0_2] : memref<16x128xf32, #tpu.memory_space<vmem>>, vector<16x128xf32>
    %cst = arith.constant dense<0.000000e+00> : vector<16x128xf32>
    %2 = tpu.matmul %0, %1, %cst {dimension_numbers = #tpu.dot_dimension_numbers<[1], [0], [0], [1], [0, 0, 1, 1], [], []>} : vector<16x16xf32>, vector<16x128xf32>, vector<16x128xf32> -> vector<16x128xf32>
    %c0_3 = arith.constant 0 : index
    %c0_4 = arith.constant 0 : index
    %3 = vector.load %arg3[%c0_3, %c0_4] : memref<2x128xf32, #tpu.memory_space<vmem>>, vector<1x128xf32>
    %4 = vector.broadcast %3 : vector<1x128xf32> to vector<16x128xf32>
    %5 = arith.addf %2, %4 : vector<16x128xf32>
    %cst_5 = arith.constant 0.000000e+00 : f32
    %6 = vector.broadcast %cst_5 : f32 to vector<16x128xf32>
    %7 = arith.maximumf %5, %6 : vector<16x128xf32>
    %c0_6 = arith.constant 0 : index
    %c0_7 = arith.constant 0 : index
    %8 = vector.load %arg4[%c0_6, %c0_7] : memref<128x128xf32, #tpu.memory_space<vmem>>, vector<128x128xf32>
    %cst_8 = arith.constant dense<0.000000e+00> : vector<16x128xf32>
    %9 = tpu.matmul %7, %8, %cst_8 {dimension_numbers = #tpu.dot_dimension_numbers<[1], [0], [0], [1], [0, 0, 1, 1], [], []>} : vector<16x128xf32>, vector<128x128xf32>, vector<16x128xf32> -> vector<16x128xf32>
    %c1 = arith.constant 1 : index
    %c0_9 = arith.constant 0 : index
    %10 = vector.load %arg3[%c1, %c0_9] : memref<2x128xf32, #tpu.memory_space<vmem>>, vector<1x128xf32>
    %11 = vector.broadcast %10 : vector<1x128xf32> to vector<16x128xf32>
    %12 = arith.addf %9, %11 : vector<16x128xf32>
    %cst_10 = arith.constant 0.000000e+00 : f32
    %13 = vector.broadcast %cst_10 : f32 to vector<16x128xf32>
    %14 = arith.maximumf %12, %13 : vector<16x128xf32>
    %c0_11 = arith.constant 0 : index
    %c0_12 = arith.constant 0 : index
    %15 = vector.load %arg5[%c0_11, %c0_12] : memref<128x256xf32, #tpu.memory_space<vmem>>, vector<128x256xf32>
    %cst_13 = arith.constant dense<0.000000e+00> : vector<16x256xf32>
    %16 = tpu.matmul %14, %15, %cst_13 {dimension_numbers = #tpu.dot_dimension_numbers<[1], [0], [0], [1], [0, 0, 1, 1], [], []>} : vector<16x128xf32>, vector<128x256xf32>, vector<16x256xf32> -> vector<16x256xf32>
    %17 = vector.extract_strided_slice %16 {offsets = [0, 0], sizes = [16, 128], strides = [1, 1]} : vector<16x256xf32> to vector<16x128xf32>
    %c0_14 = arith.constant 0 : index
    %c0_15 = arith.constant 0 : index
    %18 = vector.load %arg6[%c0_14, %c0_15] : memref<2x128xf32, #tpu.memory_space<vmem>>, vector<1x128xf32>
    %19 = vector.broadcast %18 : vector<1x128xf32> to vector<16x128xf32>
    %20 = arith.addf %17, %19 : vector<16x128xf32>
    %21 = vector.extract_strided_slice %16 {offsets = [0, 128], sizes = [16, 128], strides = [1, 1]} : vector<16x256xf32> to vector<16x128xf32>
    %c1_16 = arith.constant 1 : index
    %c0_17 = arith.constant 0 : index
    %22 = vector.load %arg6[%c1_16, %c0_17] : memref<2x128xf32, #tpu.memory_space<vmem>>, vector<1x128xf32>
    %23 = vector.broadcast %22 : vector<1x128xf32> to vector<16x128xf32>
    %24 = arith.addf %21, %23 : vector<16x128xf32>
    %cst_18 = arith.constant -2.000000e+01 : f32
    %cst_19 = arith.constant 2.000000e+00 : f32
    %25 = vector.broadcast %cst_18 : f32 to vector<16x128xf32>
    %26 = arith.maximumf %25, %24 : vector<16x128xf32>
    %27 = vector.broadcast %cst_19 : f32 to vector<16x128xf32>
    %28 = arith.minimumf %27, %26 : vector<16x128xf32>
    %c0_20 = arith.constant 0 : index
    %c0_21 = arith.constant 0 : index
    %29 = vector.load %arg7[%c0_20, %c0_21] : memref<16x128xf32, #tpu.memory_space<vmem>>, vector<16x128xf32>
    tpu.vector_store %arg7[%c0_20, %c0_21], %20 {strides = array<i32>} : memref<16x128xf32, #tpu.memory_space<vmem>>, vector<16x128xf32>,
    %c0_22 = arith.constant 0 : index
    %c0_23 = arith.constant 0 : index
    %30 = vector.load %arg8[%c0_22, %c0_23] : memref<16x128xf32, #tpu.memory_space<vmem>>, vector<16x128xf32>
    tpu.vector_store %arg8[%c0_22, %c0_23], %28 {strides = array<i32>} : memref<16x128xf32, #tpu.memory_space<vmem>>, vector<16x128xf32>,
    return
  }
  func.func @transform_0(%arg0: i32) -> (i32, i32) {
    %c0_i32 = arith.constant 0 : i32
    %c0_i32_0 = arith.constant 0 : i32
    return %arg0, %c0_i32 : i32, i32
  }
  func.func @transform_1(%arg0: i32) -> (i32, i32) {
    %c0_i32 = arith.constant 0 : i32
    %c0_i32_0 = arith.constant 0 : i32
    %c0_i32_1 = arith.constant 0 : i32
    return %c0_i32, %c0_i32_0 : i32, i32
  }
  func.func @transform_2(%arg0: i32) -> (i32, i32) {
    %c0_i32 = arith.constant 0 : i32
    %c0_i32_0 = arith.constant 0 : i32
    %c0_i32_1 = arith.constant 0 : i32
    return %c0_i32, %c0_i32_0 : i32, i32
  }
  func.func @transform_3(%arg0: i32) -> (i32, i32) {
    %c0_i32 = arith.constant 0 : i32
    %c0_i32_0 = arith.constant 0 : i32
    %c0_i32_1 = arith.constant 0 : i32
    return %c0_i32, %c0_i32_0 : i32, i32
  }
  func.func @transform_4(%arg0: i32) -> (i32, i32) {
    %c0_i32 = arith.constant 0 : i32
    %c0_i32_0 = arith.constant 0 : i32
    %c0_i32_1 = arith.constant 0 : i32
    return %c0_i32, %c0_i32_0 : i32, i32
  }
  func.func @transform_5(%arg0: i32) -> (i32, i32) {
    %c0_i32 = arith.constant 0 : i32
    %c0_i32_0 = arith.constant 0 : i32
    %c0_i32_1 = arith.constant 0 : i32
    return %c0_i32, %c0_i32_0 : i32, i32
  }
  func.func @transform_6(%arg0: i32) -> (i32, i32) {
    %c0_i32 = arith.constant 0 : i32
    %c0_i32_0 = arith.constant 0 : i32
    return %arg0, %c0_i32 : i32, i32
  }
  func.func @transform_7(%arg0: i32) -> (i32, i32) {
    %c0_i32 = arith.constant 0 : i32
    %c0_i32_0 = arith.constant 0 : i32
    return %arg0, %c0_i32 : i32, i32
  }
}

</mosaic_0001>

<bundles_post_ra>
// kernel: _actor_forward_impl.1
= control target key start
LH: loop header
LB: loop body
LE: loop exit
PB: predicated region body
PF: predicated region fallthrough
CT: control target
= control target key end

     0   :  { %13 = vsyncpa [#allocation3], 0  ;;  %s687_s0 = inlined_call_operand.vmem [shape: f32[16,16], index: 0, kind: input, shape index: {}]   ;;  %s688_s1 = inlined_call_operand.vmem [shape: f32[16,128], index: 1, kind: input, shape index: {}]   ;;  %s689_s2 = inlined_call_operand.vmem [shape: f32[2,128], index: 2, kind: input, shape index: {}]   ;;  %s690_s3 = inlined_call_operand.hbm [shape: f32[128,128], index: 3, kind: input, shape index: {}]   ;;  %s691_s4 = inlined_call_operand.hbm [shape: f32[128,256], index: 4, kind: input, shape index: {}]   ;;  %s692_s5 = inlined_call_operand.vmem [shape: f32[2,128], index: 5, kind: input, shape index: {}]   ;;  %s693_s6 = inlined_call_operand.vmem [shape: f32[16,128], index: 6, kind: output, shape index: {0}]   ;;  %s694_s7 = inlined_call_operand.vmem [shape: f32[16,128], index: 7, kind: output, shape index: {1}]  }
   0x1   :  { %14 = vsyncpa [#allocation5], 0  ;;  %s578_s24 = smov [#allocation2]   ;;  %s530_s28 = scalar_lea.hbm %s690_s3, 2048 }
   0x2   :  { %s26_s25 = sshll.u32 %s578_s24, 4  ;;  %p531_p0 = scmp.ne.s32.totalorder %s690_s3, %s530_s28  ;;  %s27_s25 = int_to_ptr.vmem [resolvable:$true] %s26_s25 }
   0x3   :  { %p534_p1 = scmp.lt.u32.totalorder %s530_s28, %s690_s3 }
   0x5   :  { %p536_p2 = pnand %p534_p1, %p531_p0 }
   0x7   :  { %539 = shalt.err (!%p536_p2)
}
   0x8   :  { %s540_s10 = scalar_lea.vmem %s27_s25, 2048  ;;  %p545_p4 = scmp.lt.s32.totalorder %s27_s25, %s27_s25 }
   0x9   :  { %p541_p3 = scmp.ne.s32.totalorder %s27_s25, %s540_s10  ;;  %p546_p5 = scmp.lt.s32.totalorder %s540_s10, %s540_s10 }
   0xb   :  { %p547_p6 = por %p546_p5, %p545_p4 }
   0xd   :  { %p548_p7 = pnand %p547_p6, %p541_p3 }
   0xf   :  { %551 = shalt.err (!%p548_p7)
}
  0x10   :  { %s579_s11 = smov 128   ;;  %s580_s12 = smov 8  }
  0x11   :  { %32 = dma.hbm_to_vmem [thread:$0]  %s690_s3, 2048, %s27_s25, [#allocation3], %s579_s11, %s579_s11, %s580_s12  }
  0x12   :  { %s581_s15 = smov [#allocation4]   ;;  %s552_s19 = scalar_lea.hbm %s691_s4, 4096 }
  0x13   :  { %s38_s16 = sshll.u32 %s581_s15, 4  ;;  %p553_p8 = scmp.ne.s32.totalorder %s691_s4, %s552_s19  ;;  %s39_s16 = int_to_ptr.vmem [resolvable:$true] %s38_s16 }
  0x14   :  { %p556_p9 = scmp.lt.u32.totalorder %s552_s19, %s691_s4 }
  0x16   :  { %p558_p10 = pnand %p556_p9, %p553_p8 }
  0x18   :  { %561 = shalt.err (!%p558_p10)
}
  0x19   :  { %s562_s24 = scalar_lea.vmem %s39_s16, 4096  ;;  %p567_p12 = scmp.lt.s32.totalorder %s39_s16, %s39_s16 }
  0x1a   :  { %p563_p11 = scmp.ne.s32.totalorder %s39_s16, %s562_s24  ;;  %p568_p13 = scmp.lt.s32.totalorder %s562_s24, %s562_s24 }
  0x1c   :  { %p569_p0 = por %p568_p13, %p567_p12 }
  0x1e   :  { %p570_p1 = pnand %p569_p0, %p563_p11 }
  0x20   :  { %573 = shalt.err (!%p570_p1)
}
  0x21   :  { %s582_s3 = smov 256   ;;  %s583_s25 = smov 16  }
  0x22   :  { %44 = dma.hbm_to_vmem [thread:$0]  %s691_s4, 4096, %s39_s16, [#allocation5], %s582_s3, %s582_s3, %s583_s25  }
  0x23   :  { %574 = dma.done.wait [#allocation3], 2048  }
  0x24   :  { %575 = vsyncadd [#allocation3], 4294965248 }
  0x25   :  { %576 = dma.done.wait [#allocation5], 4096  }
  0x26   :  { %577 = vsyncadd [#allocation5], 4294963200  ;;  %vm62_vm0 = vcmask 130048   ;;  %v55_v0 = vld [vmem:[%s688_s1] sm:$0xff]  ;;  %v56_v1 = vld [vmem:[%s688_s1 + $0x8] sm:$0xff] }
  0x27   :  { %v53_v2 = vld [vmem:[%s687_s0] sm:$0xff]  ;;  %v455_v3 = vpack.c.bf16 %v56_v1, %v55_v0  ;;  %v147_v5 = vld [vmem:[#allocation2 + $0x8] sm:$0xff]  ;;  %v148_v7 = vld [vmem:[#allocation2 + $0x10] sm:$0xff] }
  0x28   :  { %417 = vmatprep.mubr.msk.f32.mxu1 %vm62_vm0, %v53_v2  ;;  %v146_v4 = vld [vmem:[#allocation2] sm:$0xff]  ;;  %v149_v8 = vld [vmem:[#allocation2 + $0x18] sm:$0xff]  ;;  %v54_v9 = vld [vmem:[%s687_s0 + $0x8] sm:$0xff] }
  0x29   :  { %v459_v6 = vpack.c.bf16 %v147_v5, %v146_v4  ;;  %456 = vmatprep.subr.bf16.mxu1 %v455_v3  ;;  %v463_v10 = vpack.c.bf16 %v149_v8, %v148_v7  ;;  %v150_v11 = vld [vmem:[#allocation2 + $0x20] sm:$0xff]  ;;  %v151_v12 = vld [vmem:[#allocation2 + $0x28] sm:$0xff]  ;;  %v152_v14 = vld [vmem:[#allocation2 + $0x30] sm:$0xff] }
  0x2a   :  { %458 = vmatpush3.bf16.msra.mxu1 %v455_v3  ;;  %v467_v13 = vpack.c.bf16 %v151_v12, %v150_v11  ;;  %v153_v15 = vld [vmem:[#allocation2 + $0x38] sm:$0xff]  ;;  %v154_v17 = vld [vmem:[#allocation2 + $0x40] sm:$0xff]  ;;  %v155_v18 = vld [vmem:[#allocation2 + $0x48] sm:$0xff] }
  0x2b   :  { %460 = vmatprep.subr.bf16.mxu1 %v459_v6  ;;  %v471_v16 = vpack.c.bf16 %v153_v15, %v152_v14  ;;  %v475_v19 = vpack.c.bf16 %v155_v18, %v154_v17  ;;  %v156_v20 = vld [vmem:[#allocation2 + $0x50] sm:$0xff]  ;;  %v157_v21 = vld [vmem:[#allocation2 + $0x58] sm:$0xff]  ;;  %v158_v23 = vld [vmem:[#allocation2 + $0x60] sm:$0xff] }
  0x2c   :  { %v479_v22 = vpack.c.bf16 %v157_v21, %v156_v20  ;;  %v159_v24 = vld [vmem:[#allocation2 + $0x68] sm:$0xff]  ;;  %v160_v26 = vld [vmem:[#allocation2 + $0x70] sm:$0xff]  ;;  %v161_v27 = vld [vmem:[#allocation2 + $0x78] sm:$0xff]  ;;  %v584_v20 = vmov 0.0  }
  0x2d   :  { %418 = vmatmul.mubr.msk.f32.vlgmr.msra.gmra.mrb[0].mxu1 %vm62_vm0, %v54_v9  ;;  %v483_v25 = vpack.c.bf16 %v159_v24, %v158_v23  ;;  %v487_v28 = vpack.c.bf16 %v161_v27, %v160_v26  ;;  %v245_v29 = vld [vmem:[#allocation4 + $0x8] sm:$0xff]  ;;  %v247_v30 = vld [vmem:[#allocation4 + $0x18] sm:$0xff]  ;;  %v244_v31 = vld [vmem:[#allocation4] sm:$0xff]  ;;  %340 = vmatprep.mubr.f32.mxu0 %v584_v20 }
  0x2e   :  { %462 = vmatpush3.bf16.msra.mxu1 %v459_v6  ;;  %v491_v32 = vpack.c.bf16 %v247_v30, %v245_v29  ;;  %v246_v33 = vld [vmem:[#allocation4 + $0x10] sm:$0xff]  ;;  %v249_v34 = vld [vmem:[#allocation4 + $0x28] sm:$0xff]  ;;  %v251_v35 = vld [vmem:[#allocation4 + $0x38] sm:$0xff] }
  0x2f   :  { %464 = vmatprep.subr.bf16.mxu1 %v463_v10  ;;  %v493_v36 = vpack.c.bf16 %v246_v33, %v244_v31  ;;  %v495_v37 = vpack.c.bf16 %v251_v35, %v249_v34  ;;  %v248_v38 = vld [vmem:[#allocation4 + $0x20] sm:$0xff]  ;;  %v250_v39 = vld [vmem:[#allocation4 + $0x30] sm:$0xff]  ;;  %v253_v40 = vld [vmem:[#allocation4 + $0x48] sm:$0xff] }
  0x30   :  { %492 = vmatprep.subr.bf16.mxu0 %v491_v32  ;;  %v255_v41 = vld [vmem:[#allocation4 + $0x58] sm:$0xff]  ;;  %v497_v42 = vpack.c.bf16 %v250_v39, %v248_v38  ;;  %v252_v44 = vld [vmem:[#allocation4 + $0x40] sm:$0xff]  ;;  %v254_v45 = vld [vmem:[#allocation4 + $0x50] sm:$0xff] }
  0x31   :  { %494 = vmatpush1.bf16.msra.mxu0 %v493_v36  ;;  %v499_v43 = vpack.c.bf16 %v255_v41, %v253_v40  ;;  %v257_v46 = vld [vmem:[#allocation4 + $0x68] sm:$0xff]  ;;  %v259_v47 = vld [vmem:[#allocation4 + $0x78] sm:$0xff]  ;;  %v501_v48 = vpack.c.bf16 %v254_v45, %v252_v44  ;;  %v256_v50 = vld [vmem:[#allocation4 + $0x60] sm:$0xff] }
  0x32   :  { %466 = vmatpush3.bf16.msra.mxu1 %v463_v10  ;;  %496 = vmatprep.subr.bf16.mxu0 %v495_v37  ;;  %v503_v49 = vpack.c.bf16 %v259_v47, %v257_v46  ;;  %v258_v51 = vld [vmem:[#allocation4 + $0x70] sm:$0xff]  ;;  %v261_v52 = vld [vmem:[#allocation4 + $0x88] sm:$0xff]  ;;  %v263_v53 = vld [vmem:[#allocation4 + $0x98] sm:$0xff] }
  0x33   :  { %468 = vmatprep.subr.bf16.mxu1 %v467_v13  ;;  %v505_v54 = vpack.c.bf16 %v258_v51, %v256_v50  ;;  %v507_v55 = vpack.c.bf16 %v263_v53, %v261_v52  ;;  %v260_v56 = vld [vmem:[#allocation4 + $0x80] sm:$0xff]  ;;  %v262_v57 = vld [vmem:[#allocation4 + $0x90] sm:$0xff]  ;;  %v265_v58 = vld [vmem:[#allocation4 + $0xa8] sm:$0xff] }
  0x34   :  { %v267_v59 = vld [vmem:[#allocation4 + $0xb8] sm:$0xff]  ;;  %v509_v60 = vpack.c.bf16 %v262_v57, %v260_v56  ;;  %v264_v62 = vld [vmem:[#allocation4 + $0xa0] sm:$0xff]  ;;  %v266_v63 = vld [vmem:[#allocation4 + $0xb0] sm:$0xff] }
  0x35   :  { %498 = vmatpush1.bf16.msra.mxu0 %v497_v42  ;;  %v511_v61 = vpack.c.bf16 %v267_v59, %v265_v58  ;;  %v269_v0 = vld [vmem:[#allocation4 + $0xc8] sm:$0xff]  ;;  %v271_v1 = vld [vmem:[#allocation4 + $0xd8] sm:$0xff]  ;;  %v513_v2 = vpack.c.bf16 %v266_v63, %v264_v62  ;;  %v268_v4 = vld [vmem:[#allocation4 + $0xc0] sm:$0xff] }
  0x36   :  { %470 = vmatpush3.bf16.msra.mxu1 %v467_v13  ;;  %500 = vmatprep.subr.bf16.mxu0 %v499_v43  ;;  %v515_v3 = vpack.c.bf16 %v271_v1, %v269_v0  ;;  %v270_v5 = vld [vmem:[#allocation4 + $0xd0] sm:$0xff]  ;;  %v385_v7 = vld [vmem:[%s689_s2] ss:$0 sm:$0xff]  ;;  %v273_v14 = vld [vmem:[#allocation4 + $0xe8] sm:$0xff] }
  0x37   :  { %472 = vmatprep.subr.bf16.mxu1 %v471_v16  ;;  %v517_v6 = vpack.c.bf16 %v270_v5, %v268_v4  ;;  %v275_v15 = vld [vmem:[#allocation4 + $0xf8] sm:$0xff]  ;;  %v272_v17 = vld [vmem:[#allocation4 + $0xe0] sm:$0xff]  ;;  %v274_v18 = vld [vmem:[#allocation4 + $0xf0] sm:$0xff] }
  0x38   :  { %v388_v21 = vld [vmem:[%s689_s2 + $0x1] ss:$0 sm:$0xff] }
  0x39   :  { %502 = vmatpush1.bf16.msra.mxu0 %v501_v48  ;;  %v390_v29 = vld [vmem:[%s692_s5 + $0x1] ss:$0 sm:$0xff] }
  0x3a   :  { %474 = vmatpush3.bf16.msra.mxu1 %v471_v16  ;;  %504 = vmatprep.subr.bf16.mxu0 %v503_v49  ;;  %v519_v16 = vpack.c.bf16 %v275_v15, %v273_v14 }
  0x3b   :  { %476 = vmatprep.subr.bf16.mxu1 %v475_v19 }
  0x3d   :  { %506 = vmatpush1.bf16.msra.mxu0 %v505_v54 }
  0x3e   :  { %478 = vmatpush3.bf16.msra.mxu1 %v475_v19  ;;  %508 = vmatprep.subr.bf16.mxu0 %v507_v55  ;;  %v521_v19 = vpack.c.bf16 %v274_v18, %v272_v17 }
  0x3f   :  { %480 = vmatprep.subr.bf16.mxu1 %v479_v22 }
  0x41   :  { %510 = vmatpush1.bf16.msra.mxu0 %v509_v60 }
  0x42   :  { %482 = vmatpush3.bf16.msra.mxu1 %v479_v22  ;;  %512 = vmatprep.subr.bf16.mxu0 %v511_v61 }
  0x43   :  { %484 = vmatprep.subr.bf16.mxu1 %v483_v25 }
  0x45   :  { %514 = vmatpush1.bf16.msra.mxu0 %v513_v2 }
  0x46   :  { %486 = vmatpush3.bf16.msra.mxu1 %v483_v25  ;;  %516 = vmatprep.subr.bf16.mxu0 %v515_v3 }
  0x47   :  { %488 = vmatprep.subr.bf16.mxu1 %v487_v28 }
  0x49   :  { %518 = vmatpush1.bf16.msra.mxu0 %v517_v6 }
  0x4a   :  { %490 = vmatpush3.bf16.msra.mxu1 %v487_v28  ;;  %520 = vmatprep.subr.bf16.mxu0 %v519_v16  ;;  %v389_v28 = vld [vmem:[%s692_s5] ss:$0 sm:$0xff] }
  0x4d   :  { %522 = vmatpush1.bf16.msra.mxu0 %v521_v19 }
 0x100   :  { %v419_v8 = vpop.f32.mrb[0].mxu1 }
 0x101   :  { %v141_v9 = vadd.f32 %v419_v8, %v385_v7  ;;  %v135_v10 = vpop.f32.mrb[1].mxu1 }
 0x102   :  { %v136_v11 = vadd.f32 %v385_v7, %v135_v10 }
 0x103   :  { %v145_v13 = vmax.f32 %v141_v9, 0.0 }
 0x104   :  { %v144_v12 = vmax.f32 %v136_v11, 0.0 }
 0x106   :  { %452 = vmatprep.mubr.f32.mxu1 %v144_v12 }
 0x107   :  { %453 = vmatmul.mubr.f32.vlgmr.msra.gmra.mrb[2].mxu1 %v145_v13 }
 0x1da   :  { %v454_v22 = vpop.f32.mrb[2].mxu1 }
 0x1db   :  { %v233_v23 = vpop.f32.mrb[3].mxu1  ;;  %v239_v25 = vadd.f32 %v454_v22, %v388_v21 }
 0x1dc   :  { %v234_v24 = vadd.f32 %v388_v21, %v233_v23 }
 0x1dd   :  { %v243_v27 = vmax.f32 %v239_v25, 0.0 }
 0x1de   :  { %v242_v26 = vmax.f32 %v234_v24, 0.0 }
 0x1e0   :  { %341 = vmatmul.mubr.f32.vlgmr.msra.gmra.mrb[0].mxu0 %v242_v26 }
 0x1e1   :  { %346 = vmatprep.mubr.f32.mxu0 %v584_v20 }
 0x1e4   :  { %347 = vmatmul.mubr.f32.gmra.mrb[2].mxu0 %v243_v27 }
 0x2b3   :  { %v342_v30 = vpop.f32.mrb[0].mxu0 }
 0x2b4   :  { %v358_v31 = vadd.f32 %v389_v28, %v342_v30  ;;  %v344_v32 = vpop.f32.mrb[1].mxu0 }
 0x2b5   :  { %v365_v33 = vadd.f32 %v390_v29, %v344_v32 }
 0x2b6   :  { %371 = vst [vmem:[%s693_s6] sm:$0xff] %v358_v31 }
 0x2b7   :  { %v367_v34 = vmax.f32 %v365_v33, -20.0  ;;  %v348_v35 = vpop.f32.mrb[2].mxu0 }
 0x2b8   :  { %v359_v36 = vadd.f32 %v389_v28, %v348_v35  ;;  %v350_v37 = vpop.f32.mrb[3].mxu0 }
 0x2b9   :  { %v369_v38 = vmin.f32 %v367_v34, 2.0  ;;  %v366_v39 = vadd.f32 %v390_v29, %v350_v37 }
 0x2ba   :  { %372 = vst [vmem:[%s693_s6 + $0x8] sm:$0xff] %v359_v36 }
 0x2bb   :  { %373 = vst [vmem:[%s694_s7] sm:$0xff] %v369_v38  ;;  %v368_v40 = vmax.f32 %v366_v39, -20.0 }
 0x2bd   :  { %v370_v41 = vmin.f32 %v368_v40, 2.0 }
 0x2bf   :  { %374 = vst [vmem:[%s694_s7 + $0x8] sm:$0xff] %v370_v41 }
 0x2c0   :  { %383 = vsyncpa [#allocation3], 1 }
 0x2c1   :  { %384 = vsyncpa [#allocation5], 1 }

</bundles_post_ra>
